<compile_context>
chip_gen: v5e
topology: v5e:2x2
jax: 0.10.0
libtpu: 0.0.40
codegen_flags: <defaults>
</compile_context>

<pallas_src>
import functools

import jax
import jax.numpy as jnp
from jax.experimental import pallas as pl
from jax.experimental.pallas import tpu as pltpu

EPS = 1e-5  # nn.BatchNorm1d default eps


# ---------------------------------------------------------------------------
# small helpers
# ---------------------------------------------------------------------------
def _pad_dim(a, axis, size):
    pad = size - a.shape[axis]
    if pad <= 0:
        return a
    widths = [(0, 0)] * a.ndim
    widths[axis] = (0, pad)
    return jnp.pad(a, widths)


def _pick_tn(n, cap):
    """Pick an N-tile that divides n whenever possible (so the in-kernel mask
    is statically elided); multiples of 8 satisfy the (8,128) block rule."""
    if n <= cap:
        return n
    for t in range(cap, 7, -8):
        if n % t == 0:
            return t
    return cap  # no aligned divisor: fall back to the masked last-tile path


# ---------------------------------------------------------------------------
# Pallas kernels
# ---------------------------------------------------------------------------
def _conv_bn_stats_kernel(*refs, has_affine, in_relu, has_bias, batched_w,
                          track_extrema, needs_mask, n_total, tn):
    """One (batch, N-tile) step of a 1x1-conv producer.

    y = f(x) @ W [+ b]  with f an optional per-channel affine(+ReLU) of the
    previous BN (only when a ReLU prevents folding it into W host-side).
    Writes y (unless track_extrema) and accumulates per-batch BN statistics of
    the raw output across the N-tile axis; with track_extrema it additionally
    tracks the per-batch running max/min so BN+max-pool never materializes the
    [B, N, C] activation.  Column reductions run on the MXU (ones-row matmuls)
    to keep them off the VPU slot, which saturates first on v6e/v7x.
    """
    i = 0
    x_ref = refs[i]; i += 1
    if has_affine:
        sc_ref, sh_ref = refs[i], refs[i + 1]; i += 2
    w_ref = refs[i]; i += 1
    if has_bias:
        b_ref = refs[i]; i += 1
    if track_extrema:
        sum_ref, sq_ref, max_ref, min_ref = refs[i:i + 4]
    else:
        y_ref, sum_ref, sq_ref = refs[i:i + 3]

    step = pl.program_id(1)

    h = x_ref[0]                                          # (TN, K) bf16
    if has_affine:
        h = h.astype(jnp.float32) * sc_ref[...] + sh_ref[...]
        if in_relu:
            h = jnp.maximum(h, 0.0)
        h = h.astype(jnp.bfloat16)

    w = w_ref[0] if batched_w else w_ref[...]             # (K, C) bf16
    y = jnp.dot(h, w, preferred_element_type=jnp.float32)  # MXU, f32 accum
    if has_bias:
        y = y + b_ref[0]                                  # per-batch constant

    if not track_extrema:
        # Partial last blocks: Pallas clips the out-of-range rows on writeback.
        y_ref[0] = y.astype(y_ref.dtype)

    mask = None
    if needs_mask:                                        # traced only if N % TN != 0
        valid = n_total - step * tn
        row = jax.lax.broadcasted_iota(jnp.int32, (tn, 1), 0)
        mask = row < valid

    ys = y if mask is None else jnp.where(mask, y, 0.0)
    # Column reductions as (1, TN) @ (TN, C) f32 matmuls: the MXU has slack in
    # these kernels while sublane add-chains would land on the binding VPU
    # slot (v6e/v7x).  The squaring stays on the VPU in f32.
    ones_row = jnp.ones((1, tn), jnp.float32)
    part_sum = jnp.dot(ones_row, ys, preferred_element_type=jnp.float32)
    part_sq = jnp.dot(ones_row, ys * ys, preferred_element_type=jnp.float32)

    @pl.when(step == 0)
    def _():
        sum_ref[...] = jnp.zeros_like(sum_ref)
        sq_ref[...] = jnp.zeros_like(sq_ref)
        if track_extrema:
            max_ref[...] = jnp.full(max_ref.shape, -jnp.inf, max_ref.dtype)
            min_ref[...] = jnp.full(min_ref.shape, jnp.inf, min_ref.dtype)

    sum_ref[0] += part_sum
    sq_ref[0] += part_sq
    if track_extrema:
        ymax = y if mask is None else jnp.where(mask, y, -jnp.inf)
        ymin = y if mask is None else jnp.where(mask, y, jnp.inf)
        max_ref[0] = jnp.maximum(max_ref[0], jnp.max(ymax, axis=0, keepdims=True))
        min_ref[0] = jnp.minimum(min_ref[0], jnp.min(ymin, axis=0, keepdims=True))


def _mlp3_kernel(x_ref, w1_ref, b1_ref, g1_ref, be1_ref,
                 w2_ref, b2_ref, g2_ref, be2_ref,
                 w3_ref, b3_ref, o_ref, *, bn, softmax):
    """Fused 3-layer FC stack; all weights VMEM-resident, rows = batch."""
    def layer(h, w, b, g, be):
        y = jnp.dot(h.astype(jnp.bfloat16), w,
                    preferred_element_type=jnp.float32) + b
        if bn:  # training-mode BatchNorm over the batch rows
            mean = jnp.mean(y, axis=0, keepdims=True)
            var = jnp.mean(jnp.square(y - mean), axis=0, keepdims=True)
            y = (y - mean) * jax.lax.rsqrt(var + EPS) * g + be
        return jnp.maximum(y, 0.0)

    h = x_ref[...].astype(jnp.float32)
    h = layer(h, w1_ref[...], b1_ref[...], g1_ref[...], be1_ref[...])
    h = layer(h, w2_ref[...], b2_ref[...], g2_ref[...], be2_ref[...])
    y = jnp.dot(h.astype(jnp.bfloat16), w3_ref[...],
                preferred_element_type=jnp.float32) + b3_ref[...]
    if softmax:
        m = jnp.max(y, axis=1, keepdims=True)
        e = jnp.exp(y - m)
        y = e / jnp.sum(e, axis=1, keepdims=True)
    o_ref[...] = y


# ---------------------------------------------------------------------------
# Pallas wrappers
# ---------------------------------------------------------------------------
def conv_layer(x, w, *, bias=None, scale=None, shift=None, in_relu=False,
               batched_w=False, track_extrema=False, out_dtype=jnp.bfloat16,
               tn_cap=None):
    """Per-point conv (Conv1d k=1) producer with fused BN statistics.

    x:      [B, N, K] activations.
    w:      [K, C] shared or [B, K, C] per-batch (transforms already folded in).
    bias:   optional per-batch [B, C] constant (only needed when it does NOT
            cancel under the consumer's BatchNorm, i.e. when it is batched).
    scale/shift: per-channel input affine of the previous BN; only used
            together with in_relu=True - otherwise fold it into w host-side.
    Returns (y, sum, sumsq) or (sum, sumsq, max, min) when track_extrema; the
    statistics are per-batch partials over N, reduced on the host.
    """
    B, N, K = x.shape
    C = w.shape[-1]
    if tn_cap is None:
        # Small-C layers are HBM/overhead bound -> big tiles; C=1024 layers keep
        # their f32 (TN, C) temporaries inside the default scoped-VMEM budget.
        tn_cap = 2048 if C <= 256 else 512
    TN = _pick_tn(N, tn_cap)
    nt = pl.cdiv(N, TN)
    needs_mask = (N % TN) != 0

    has_affine = scale is not None
    has_bias = bias is not None

    in_specs = [pl.BlockSpec((1, TN, K), lambda b_, n_: (b_, n_, 0))]
    args = [x.astype(jnp.bfloat16)]
    if has_affine:
        in_specs += [pl.BlockSpec((1, K), lambda b_, n_: (0, 0))] * 2
        args += [scale.reshape(1, K).astype(jnp.float32),
                 shift.reshape(1, K).astype(jnp.float32)]
    if batched_w:
        in_specs.append(pl.BlockSpec((1, K, C), lambda b_, n_: (b_, 0, 0)))
    else:
        in_specs.append(pl.BlockSpec((K, C), lambda b_, n_: (0, 0)))
    args.append(w.astype(jnp.bfloat16))
    if has_bias:
        in_specs.append(pl.BlockSpec((1, 1, C), lambda b_, n_: (b_, 0, 0)))
        args.append(bias.reshape(B, 1, C).astype(jnp.float32))

    stat_spec = pl.BlockSpec((1, 1, C), lambda b_, n_: (b_, 0, 0))
    stat_shape = jax.ShapeDtypeStruct((B, 1, C), jnp.float32)
    kernel = functools.partial(
        _conv_bn_stats_kernel, has_affine=has_affine, in_relu=in_relu,
        has_bias=has_bias, batched_w=batched_w, track_extrema=track_extrema,
        needs_mask=needs_mask, n_total=N, tn=TN)
    # TODO(synk): on v7x with B == 1 (or odd B), add a leading parallel grid
    # axis splitting the N range across the two TensorCores and merge the
    # per-core stat partials on the host.
    cp = pltpu.CompilerParams(dimension_semantics=("parallel", "arbitrary"))

    if track_extrema:
        s, q, mx, mn = pl.pallas_call(
            kernel, out_shape=(stat_shape,) * 4, grid=(B, nt),
            in_specs=in_specs, out_specs=(stat_spec,) * 4,
            compiler_params=cp)(*args)
        return s.reshape(B, C), q.reshape(B, C), mx.reshape(B, C), mn.reshape(B, C)

    # TODO(synk): on v5e a C=64 output is a lane-sparse (64/128) store; if the
    # store slot saturates, present y as a lane-dense slab and undo it in the
    # consumer's index map.
    y_spec = pl.BlockSpec((1, TN, C), lambda b_, n_: (b_, n_, 0))
    y, s, q = pl.pallas_call(
        kernel,
        out_shape=(jax.ShapeDtypeStruct((B, N, C), out_dtype),
                   stat_shape, stat_shape),
        grid=(B, nt), in_specs=in_specs,
        out_specs=(y_spec, stat_spec, stat_spec),
        compiler_params=cp)(*args)
    return y, s.reshape(B, C), q.reshape(B, C)


def mlp3(x, w1, b1, w2, b2, w3, b3,
         g1=None, be1=None, g2=None, be2=None, *, bn=False, softmax=False):
    B = x.shape[0]
    C1, C2, C3 = w1.shape[1], w2.shape[1], w3.shape[1]
    if g1 is None:
        g1, be1 = jnp.ones((C1,), jnp.float32), jnp.zeros((C1,), jnp.float32)
    if g2 is None:
        g2, be2 = jnp.ones((C2,), jnp.float32), jnp.zeros((C2,), jnp.float32)

    args = (x.astype(jnp.float32),
            w1.astype(jnp.bfloat16), b1.reshape(1, C1).astype(jnp.float32),
            g1.reshape(1, C1).astype(jnp.float32), be1.reshape(1, C1).astype(jnp.float32),
            w2.astype(jnp.bfloat16), b2.reshape(1, C2).astype(jnp.float32),
            g2.reshape(1, C2).astype(jnp.float32), be2.reshape(1, C2).astype(jnp.float32),
            w3.astype(jnp.bfloat16), b3.reshape(1, C3).astype(jnp.float32))

    def full_spec(shape):
        nd = len(shape)
        return pl.BlockSpec(shape, lambda i, _nd=nd: (0,) * _nd)

    kernel = functools.partial(_mlp3_kernel, bn=bn, softmax=softmax)
    return pl.pallas_call(
        kernel,
        out_shape=jax.ShapeDtypeStruct((B, C3), jnp.float32),
        grid=(1,),
        in_specs=[full_spec(a.shape) for a in args],
        out_specs=full_spec((B, C3)),
        compiler_params=pltpu.CompilerParams(dimension_semantics=("arbitrary",)),
    )(*args)


def _bn_affine(s, q, count, gamma, beta):
    """Training-mode BatchNorm affine (y*scale + shift) from per-batch partial
    sums of the *raw* (bias-free) conv output.  The conv bias / any shared
    per-channel input constant cancels under BN, so it is never added
    in-kernel.  Note: E[x^2]-E[x]^2 in f32 can lose precision for very large
    counts with large channel means (clamped at 0); a shifted-sum / Welford
    merge would be the robust fix."""
    mean = jnp.sum(s, axis=0) / count
    var = jnp.maximum(jnp.sum(q, axis=0) / count - mean * mean, 0.0)
    scale = gamma * jax.lax.rsqrt(var + EPS)
    shift = beta - mean * scale
    return scale, shift


# ---------------------------------------------------------------------------
# Deterministic parameter initialization (PyTorch-like uniform(-1/sqrt(fan_in)))
# ---------------------------------------------------------------------------
def _init_linear(key, fan_in, fan_out):
    kw, kb = jax.random.split(key)
    bound = 1.0 / (fan_in ** 0.5)
    w = jax.random.uniform(kw, (fan_in, fan_out), jnp.float32, -bound, bound)
    b = jax.random.uniform(kb, (fan_out,), jnp.float32, -bound, bound)
    return w, b


def _init_bn(c):
    return jnp.ones((c,), jnp.float32), jnp.zeros((c,), jnp.float32)


def init_tnet(key, in_dim):
    ks = jax.random.split(key, 6)
    p = {"in_dim": in_dim}
    p["conv1_w"], p["conv1_b"] = _init_linear(ks[0], in_dim, 64)
    p["conv2_w"], p["conv2_b"] = _init_linear(ks[1], 64, 128)
    p["conv3_w"], p["conv3_b"] = _init_linear(ks[2], 128, 1024)
    p["fc1_w"], p["fc1_b"] = _init_linear(ks[3], 1024, 512)
    p["fc2_w"], p["fc2_b"] = _init_linear(ks[4], 512, 256)
    p["fc3_w"], p["fc3_b"] = _init_linear(ks[5], 256, in_dim * in_dim)
    p["bn1_g"], p["bn1_b"] = _init_bn(64)
    p["bn2_g"], p["bn2_b"] = _init_bn(128)
    p["bn3_g"], p["bn3_b"] = _init_bn(1024)
    p["bn4_g"], p["bn4_b"] = _init_bn(512)
    p["bn5_g"], p["bn5_b"] = _init_bn(256)
    return p


def init_pointnet_cls(key, point_dim=3, num_classes=16):
    ks = jax.random.split(key, 8)
    p = {"point_dim": point_dim, "num_classes": num_classes}
    p["pn_conv1_w"], p["pn_conv1_b"] = _init_linear(ks[0], point_dim, 64)
    p["pn_conv2_w"], p["pn_conv2_b"] = _init_linear(ks[1], 64, 128)
    p["pn_conv3_w"], p["pn_conv3_b"] = _init_linear(ks[2], 128, 1024)
    p["pn_bn1_g"], p["pn_bn1_b"] = _init_bn(64)
    p["pn_bn2_g"], p["pn_bn2_b"] = _init_bn(128)
    p["pn_bn3_g"], p["pn_bn3_b"] = _init_bn(1024)
    p["t1"] = init_tnet(ks[3], 3)
    p["t2"] = init_tnet(ks[4], 64)
    p["cls_conv1_w"], p["cls_conv1_b"] = _init_linear(ks[5], 1024, 512)
    p["cls_conv2_w"], p["cls_conv2_b"] = _init_linear(ks[6], 512, 256)
    p["cls_conv3_w"], p["cls_conv3_b"] = _init_linear(ks[7], 256, num_classes)
    return p


# ---------------------------------------------------------------------------
# Forward passes (tiny glue in plain JAX, heavy compute in Pallas kernels)
# ---------------------------------------------------------------------------
def tnet_forward(p, x, conv1_w=None, tn_cap=None):
    """x: [B, N, K] raw kernel activations.  Any per-channel affine of the true
    TNet input (e.g. the caller's BatchNorm) must already be folded into
    conv1_w (scale only; the shift constant and conv bias cancel under this
    TNet's bn1).  Returns the [B, in_dim, in_dim] transform."""
    B, N, _ = x.shape
    d = p["in_dim"]
    count = B * N
    w1 = p["conv1_w"] if conv1_w is None else conv1_w

    y1, s1, q1 = conv_layer(x, w1, tn_cap=tn_cap)
    sc1, sh1 = _bn_affine(s1, q1, count, p["bn1_g"], p["bn1_b"])

    y2, s2, q2 = conv_layer(y1, p["conv2_w"], scale=sc1, shift=sh1,
                            in_relu=True, tn_cap=tn_cap)
    sc2, sh2 = _bn_affine(s2, q2, count, p["bn2_g"], p["bn2_b"])

    # conv3 + bn3 + relu + max-over-points fused: only per-batch stats and
    # extrema leave the kernel, never the [B, N, 1024] activation.
    s3, q3, mx, mn = conv_layer(y2, p["conv3_w"], scale=sc2, shift=sh2,
                                in_relu=True, track_extrema=True, tn_cap=tn_cap)
    sc3, sh3 = _bn_affine(s3, q3, count, p["bn3_g"], p["bn3_b"])
    ext = jnp.where(sc3 >= 0.0, mx, mn)            # max(bn(y)) via sign of scale
    pooled = jnp.maximum(ext * sc3 + sh3, 0.0)     # relu(bn3(max_n y))  [B, 1024]

    g = mlp3(pooled, p["fc1_w"], p["fc1_b"], p["fc2_w"], p["fc2_b"],
             p["fc3_w"], p["fc3_b"], p["bn4_g"], p["bn4_b"],
             p["bn5_g"], p["bn5_b"], bn=True, softmax=False)
    g = g + jnp.eye(d, dtype=jnp.float32).reshape(1, d * d)
    return g.reshape(B, d, d)


def pointnet_classification_forward(p, x, *, tn_cap=None):
    """x: [B, N, point_dim] -> [B, num_classes, 1] softmax scores
    (PointNetClassification.forward; BatchNorm uses batch statistics)."""
    B, N, _ = x.shape
    count = B * N
    # Pad the 3-wide point channel to 8 so the MXU contraction is aligned.
    xb = _pad_dim(x.astype(jnp.bfloat16), 2, 8)

    # ----- input transform t1 = TNet_3(x^T), folded into conv1 -----
    # (x @ t1) @ W1 == x @ (t1 @ W1); conv biases cancel under the trailing BN.
    t1 = tnet_forward(p["t1"], xb, conv1_w=_pad_dim(p["t1"]["conv1_w"], 0, 8),
                      tn_cap=tn_cap)                                  # [B, 3, 3]
    wf1 = _pad_dim(jnp.einsum("bij,jk->bik", t1, p["pn_conv1_w"]), 1, 8)
    y1, s1, q1 = conv_layer(xb, wf1, batched_w=True, tn_cap=tn_cap)
    sc1, sh1 = _bn_affine(s1, q1, count, p["pn_bn1_g"], p["pn_bn1_b"])

    # ----- feature transform t2 = TNet_64(bn1(y1)); bn1 folded into its conv1 -----
    t2 = tnet_forward(p["t2"], y1, conv1_w=sc1[:, None] * p["t2"]["conv1_w"],
                      tn_cap=tn_cap)                                  # [B, 64, 64]

    # ----- conv2: (bn1(y1) @ t2) @ W2 = y1 @ (diag(sc1) t2 W2) + (sh1 t2 W2 + b2) ----
    t2w2 = jnp.einsum("bij,jc->bic", t2, p["pn_conv2_w"])             # [B, 64, 128]
    wf2 = sc1[None, :, None] * t2w2
    bf2 = jnp.einsum("j,bjc->bc", sh1, t2w2) + p["pn_conv2_b"]        # per-batch: keep
    y2, s2, q2 = conv_layer(y1, wf2, bias=bf2, batched_w=True, tn_cap=tn_cap)
    sc2, sh2 = _bn_affine(s2, q2, count, p["pn_bn2_g"], p["pn_bn2_b"])

    # ----- conv3 + bn3 + global max-pool fused (bn2 folded into W3) -----
    wf3 = sc2[:, None] * p["pn_conv3_w"]
    s3, q3, mx, mn = conv_layer(y2, wf3, track_extrema=True, tn_cap=tn_cap)
    sc3, sh3 = _bn_affine(s3, q3, count, p["pn_bn3_g"], p["pn_bn3_b"])
    ext = jnp.where(sc3 >= 0.0, mx, mn)
    pooled = ext * sc3 + sh3                                          # [B, 1024]

    # ----- head: relu(fc512) -> relu(fc256) -> fc(num_classes) -> softmax -----
    out = mlp3(pooled, p["cls_conv1_w"], p["cls_conv1_b"],
               p["cls_conv2_w"], p["cls_conv2_b"],
               p["cls_conv3_w"], p["cls_conv3_b"], bn=False, softmax=True)
    return out.reshape(B, p["num_classes"], 1)


if __name__ == "__main__":
    key = jax.random.PRNGKey(0)
    kp, kx = jax.random.split(key)
    point_dim, num_classes, batch, num_points = 3, 16, 2, 256
    params = init_pointnet_cls(kp, point_dim=point_dim, num_classes=num_classes)
    x = jax.random.normal(kx, (batch, num_points, point_dim), jnp.float32)

    # Small tn_cap so the multi-tile stat-accumulation path is exercised even at
    # this tiny test size (production: tn_cap=None -> 512 / 2048 per layer).
    out = pointnet_classification_forward(params, x, tn_cap=64)
    out = jax.block_until_ready(out)

    assert out.shape == (batch, num_classes, 1)
    assert bool(jnp.all(jnp.isfinite(out)))
    assert bool(jnp.allclose(jnp.sum(out, axis=1), 1.0, atol=1e-5))
    print("KERNEL_OK")
</pallas_src>

<mosaic_0001>
module attributes {stable_mosaic.version = 11 : i64} {
  func.func @_conv_bn_stats_kernel(%arg0: i32, %arg1: i32, %arg2: memref<1x64x8xbf16, #tpu.memory_space<vmem>>, %arg3: memref<8x64xbf16, #tpu.memory_space<vmem>>, %arg4: memref<1x64x64xbf16, #tpu.memory_space<vmem>>, %arg5: memref<1x1x64xf32, #tpu.memory_space<vmem>>, %arg6: memref<1x1x64xf32, #tpu.memory_space<vmem>>) attributes {dimension_semantics = [#tpu.dimension_semantics<parallel>, #tpu.dimension_semantics<arbitrary>], iteration_bounds = array<i64: 2, 4>, scalar_prefetch = 0 : i64, scratch_operands = 0 : i64, tpu.core_type = #tpu.core_type<tc>, window_params = [{transform_indices = @transform_0, window_bounds = array<i64: 1, 64, 8>}, {pipeline_mode = #tpu.pipeline_mode<synchronous>, transform_indices = @transform_1, window_bounds = array<i64: 8, 64>}, {transform_indices = @transform_2, window_bounds = array<i64: 1, 64, 64>}, {transform_indices = @transform_3, window_bounds = array<i64: 1, 1, 64>}, {transform_indices = @transform_4, window_bounds = array<i64: 1, 1, 64>}]} {
    %c0 = arith.constant 0 : index
    %c0_0 = arith.constant 0 : index
    %c0_1 = arith.constant 0 : index
    %0 = vector.load %arg2[%c0, %c0_0, %c0_1] : memref<1x64x8xbf16, #tpu.memory_space<vmem>>, vector<1x64x8xbf16>
    %1 = vector.shape_cast %0 : vector<1x64x8xbf16> to vector<64x8xbf16>
    %c0_2 = arith.constant 0 : index
    %c0_3 = arith.constant 0 : index
    %2 = vector.load %arg3[%c0_2, %c0_3] : memref<8x64xbf16, #tpu.memory_space<vmem>>, vector<8x64xbf16>
    %cst = arith.constant dense<0.000000e+00> : vector<64x64xf32>
    %3 = tpu.matmul %1, %2, %cst {dimension_numbers = #tpu.dot_dimension_numbers<[1], [0], [0], [1], [0, 0, 1, 1], [], []>} : vector<64x8xbf16>, vector<8x64xbf16>, vector<64x64xf32> -> vector<64x64xf32>
    %4 = arith.truncf %3 : vector<64x64xf32> to vector<64x64xbf16>
    %c0_4 = arith.constant 0 : index
    %c0_5 = arith.constant 0 : index
    %c0_6 = arith.constant 0 : index
    %5 = vector.load %arg4[%c0_4, %c0_5, %c0_6] : memref<1x64x64xbf16, #tpu.memory_space<vmem>>, vector<1x64x64xbf16>
    %6 = vector.shape_cast %5 : vector<1x64x64xbf16> to vector<64x64xbf16>
    %7 = vector.shape_cast %4 : vector<64x64xbf16> to vector<1x64x64xbf16>
    tpu.vector_store %arg4[%c0_4, %c0_5, %c0_6], %7 {strides = array<i32>} : memref<1x64x64xbf16, #tpu.memory_space<vmem>>, vector<1x64x64xbf16>,
    %cst_7 = arith.constant 1.000000e+00 : f32
    %8 = vector.broadcast %cst_7 : f32 to vector<1x64xf32>
    %cst_8 = arith.constant dense<0.000000e+00> : vector<1x64xf32>
    %9 = tpu.matmul %8, %3, %cst_8 {dimension_numbers = #tpu.dot_dimension_numbers<[1], [0], [0], [1], [0, 0, 1, 1], [], []>} : vector<1x64xf32>, vector<64x64xf32>, vector<1x64xf32> -> vector<1x64xf32>
    %10 = arith.mulf %3, %3 : vector<64x64xf32>
    %cst_9 = arith.constant dense<0.000000e+00> : vector<1x64xf32>
    %11 = tpu.matmul %8, %10, %cst_9 {dimension_numbers = #tpu.dot_dimension_numbers<[1], [0], [0], [1], [0, 0, 1, 1], [], []>} : vector<1x64xf32>, vector<64x64xf32>, vector<1x64xf32> -> vector<1x64xf32>
    %c0_i32 = arith.constant 0 : i32
    %12 = arith.cmpi eq, %arg1, %c0_i32 : i32
    %13 = arith.extui %12 : i1 to i32
    %c0_i32_10 = arith.constant 0 : i32
    %14 = arith.cmpi ne, %13, %c0_i32_10 : i32
    scf.if %14 {
      %cst_23 = arith.constant 0.000000e+00 : f32
      %27 = vector.broadcast %cst_23 : f32 to vector<1x1x64xf32>
      %c0_24 = arith.constant 0 : index
      %c0_25 = arith.constant 0 : index
      %c0_26 = arith.constant 0 : index
      %28 = vector.load %arg5[%c0_24, %c0_25, %c0_26] : memref<1x1x64xf32, #tpu.memory_space<vmem>>, vector<1x1x64xf32>
      tpu.vector_store %arg5[%c0_24, %c0_25, %c0_26], %27 {strides = array<i32>} : memref<1x1x64xf32, #tpu.memory_space<vmem>>, vector<1x1x64xf32>,
      %cst_27 = arith.constant 0.000000e+00 : f32
      %29 = vector.broadcast %cst_27 : f32 to vector<1x1x64xf32>
      %c0_28 = arith.constant 0 : index
      %c0_29 = arith.constant 0 : index
      %c0_30 = arith.constant 0 : index
      %30 = vector.load %arg6[%c0_28, %c0_29, %c0_30] : memref<1x1x64xf32, #tpu.memory_space<vmem>>, vector<1x1x64xf32>
      tpu.vector_store %arg6[%c0_28, %c0_29, %c0_30], %29 {strides = array<i32>} : memref<1x1x64xf32, #tpu.memory_space<vmem>>, vector<1x1x64xf32>,
    } else {
    }
    %c0_11 = arith.constant 0 : index
    %c0_12 = arith.constant 0 : index
    %c0_13 = arith.constant 0 : index
    %15 = vector.load %arg5[%c0_11, %c0_12, %c0_13] : memref<1x1x64xf32, #tpu.memory_space<vmem>>, vector<1x1x64xf32>
    %16 = vector.shape_cast %15 : vector<1x1x64xf32> to vector<1x64xf32>
    %17 = arith.addf %16, %9 : vector<1x64xf32>
    %c0_14 = arith.constant 0 : index
    %c0_15 = arith.constant 0 : index
    %c0_16 = arith.constant 0 : index
    %18 = vector.load %arg5[%c0_14, %c0_15, %c0_16] : memref<1x1x64xf32, #tpu.memory_space<vmem>>, vector<1x1x64xf32>
    %19 = vector.shape_cast %18 : vector<1x1x64xf32> to vector<1x64xf32>
    %20 = vector.shape_cast %17 : vector<1x64xf32> to vector<1x1x64xf32>
    tpu.vector_store %arg5[%c0_14, %c0_15, %c0_16], %20 {strides = array<i32>} : memref<1x1x64xf32, #tpu.memory_space<vmem>>, vector<1x1x64xf32>,
    %c0_17 = arith.constant 0 : index
    %c0_18 = arith.constant 0 : index
    %c0_19 = arith.constant 0 : index
    %21 = vector.load %arg6[%c0_17, %c0_18, %c0_19] : memref<1x1x64xf32, #tpu.memory_space<vmem>>, vector<1x1x64xf32>
    %22 = vector.shape_cast %21 : vector<1x1x64xf32> to vector<1x64xf32>
    %23 = arith.addf %22, %11 : vector<1x64xf32>
    %c0_20 = arith.constant 0 : index
    %c0_21 = arith.constant 0 : index
    %c0_22 = arith.constant 0 : index
    %24 = vector.load %arg6[%c0_20, %c0_21, %c0_22] : memref<1x1x64xf32, #tpu.memory_space<vmem>>, vector<1x1x64xf32>
    %25 = vector.shape_cast %24 : vector<1x1x64xf32> to vector<1x64xf32>
    %26 = vector.shape_cast %23 : vector<1x64xf32> to vector<1x1x64xf32>
    tpu.vector_store %arg6[%c0_20, %c0_21, %c0_22], %26 {strides = array<i32>} : memref<1x1x64xf32, #tpu.memory_space<vmem>>, vector<1x1x64xf32>,
    return
  }
  func.func @transform_0(%arg0: i32, %arg1: i32) -> (i32, i32, i32) {
    %c0_i32 = arith.constant 0 : i32
    %c0_i32_0 = arith.constant 0 : i32
    return %arg0, %arg1, %c0_i32 : i32, i32, i32
  }
  func.func @transform_1(%arg0: i32, %arg1: i32) -> (i32, i32) {
    %c0_i32 = arith.constant 0 : i32
    %c0_i32_0 = arith.constant 0 : i32
    %c0_i32_1 = arith.constant 0 : i32
    return %c0_i32, %c0_i32_0 : i32, i32
  }
  func.func @transform_2(%arg0: i32, %arg1: i32) -> (i32, i32, i32) {
    %c0_i32 = arith.constant 0 : i32
    %c0_i32_0 = arith.constant 0 : i32
    return %arg0, %arg1, %c0_i32 : i32, i32, i32
  }
  func.func @transform_3(%arg0: i32, %arg1: i32) -> (i32, i32, i32) {
    %c0_i32 = arith.constant 0 : i32
    %c0_i32_0 = arith.constant 0 : i32
    %c0_i32_1 = arith.constant 0 : i32
    return %arg0, %c0_i32, %c0_i32_0 : i32, i32, i32
  }
  func.func @transform_4(%arg0: i32, %arg1: i32) -> (i32, i32, i32) {
    %c0_i32 = arith.constant 0 : i32
    %c0_i32_0 = arith.constant 0 : i32
    %c0_i32_1 = arith.constant 0 : i32
    return %arg0, %c0_i32, %c0_i32_0 : i32, i32, i32
  }
}

</mosaic_0001>

<bundles_post_ra>
// kernel: tpu_custom_call.1
= control target key start
LH: loop header
LB: loop body
LE: loop exit
PB: predicated region body
PF: predicated region fallthrough
CT: control target
= control target key end

     0   :  { %s1029_s0 = inlined_call_operand.vmem [shape: bf16[2,256,8], index: 0, kind: input, shape index: {}]   ;;  %s1030_s1 = inlined_call_operand.vmem [shape: bf16[8,64], index: 1, kind: input, shape index: {}]   ;;  %s1031_s2 = inlined_call_operand.vmem [shape: bf16[2,256,64], index: 2, kind: output, shape index: {0}]   ;;  %s1032_s3 = inlined_call_operand.hbm [shape: f32[2,1,64], index: 3, kind: output, shape index: {1}]   ;;  %s1033_s4 = inlined_call_operand.hbm [shape: f32[2,1,64], index: 4, kind: output, shape index: {2}]  }
   0x1   :  { %1034 = sst [smem:[#allocation8_spill]] %s1029_s0 }
   0x2   :  { %1035 = sst [smem:[#allocation9_spill]] %s1030_s1 }
   0x3   :  { %10 = vsyncpa [#allocation3], 0 }
   0x4   :  { %12 = vsyncpa [#allocation3 + $0x1], 0 }
   0x5   :  { %13 = vsyncpa [#allocation5], 0 }
   0x6   :  { %15 = vsyncpa [#allocation5 + $0x1], 0  ;;  %s870_s15 = smov 0   ;;  %s872_s16 = smov 0  }
   0x7   :  { %s874_s17 = smov 0   ;;  %s876_s18 = smov 0  }
   0x8   :  { %s878_s19 = smov 0   ;;  %s880_s20 = smov 0  }
   0x9   :  { %s882_s21 = smov 0   ;;  %s884_s22 = smov 0  }
   0xa LB: > { %s595_s23 = sadd.s32 4294967295, %s841_s22   ;;  %s596_s24 = sadd.s32 4294967294, %s841_s22   ;;  %s841_s22 = sphi %s884_s22, %s21_s22   ;;  %s837_s21 = sphi %s882_s21, %s1046_s21   ;;  %s833_s20 = sphi %s880_s20, %s1045_s20   ;;  %s829_s19 = sphi %s878_s19, %s1044_s19   ;;  %s825_s18 = sphi %s876_s18, %s1043_s18   ;;  %s821_s17 = sphi %s874_s17, %s1042_s17   ;;  %s817_s16 = sphi %s872_s16, %s1041_s16   ;;  %s813_s15 = sphi %s870_s15, %s1040_s15  }
   0xb   : > { %s30_s25 = sadd.s32 1, %s833_s20  ;;  %s33_s26 = sadd.s32 1, %s837_s21 }
   0xc   : > { %p31_p0 = scmp.ge.s32.totalorder %s30_s25, 4  ;;  %p127_p1 = scmp.ne.s32.totalorder %s821_s17, %s817_s16 }
   0xd   : > { %p128_p2 = scmp.eq.s32.totalorder %s595_s23, 7  ;;  %p133_p4 = scmp.ne.s32.totalorder %s817_s16, %s813_s15 }
   0xe   : > { %s1048_s25 = smov (%p31_p0, %s30_s25), 0  ;;  %s1050_s26 = smov (!%p31_p0, %s33_s26), %s837_s21 }
   0xf   : > { %p919_p3 = por %p128_p2, %p127_p1  ;;  %p35_p5 = scmp.ge.s32.totalorder %s1050_s26, 2 }
  0x10   : > { %p134_p6 = scmp.eq.s32.totalorder %s596_s24, 7  ;;  %p599_p7 = scmp.ge.s32.totalorder %s841_s22, 1 }
  0x11   : > { %p194_p8 = scmp.lt.s32.totalorder %s841_s22, 9  ;;  %s1052_s26 = smov (%p35_p5, %s1050_s26), 0 }
  0x12   : > { %p929_p9 = por %p134_p6, %p133_p4  ;;  %s114_s29 = ssub.s32 %s837_s21, %s1052_s26 }
  0x13   : > { %p195_p10 = pnand %p599_p7, %p194_p8  ;;  %s117_s30 = sadd.s32 1, %s821_s17 }
  0x14   : > { %p115_p11 = scmp.eq.s32.totalorder %s114_s29, 0  ;;  %s1038_s1 = sld [smem:[#allocation9_spill]] (!%p195_p10) }
  0x15   : > { %198 = sbr.rel (%p195_p10) target bundleno = 368 (0x170), region = 28  ;;  %s600_s8 = sshll.u32 (!%p195_p10), %s825_s18, 3 }
  0x16   : > { %s937_s5 = scalar_select %p115_p11, %s821_s17, %s117_s30  }
  0x17   : > { %p237_p12 = scmp.lt.s32.totalorder (!%p195_p10), %s829_s19, 1  ;;  %p239_p13 = scmp.lt.s32.totalorder (!%p195_p10), %s600_s8, 31 }
  0x18   : > { %s945_s9 = sand.u32 (!%p195_p10), 1, %s817_s16   ;;  %s1039_s0 = sld [smem:[#allocation8_spill]] (!%p195_p10) }
  0x19   : > { %s229_s7 = scalar_lea.vmem (!%p195_p10), [#allocation2], %s945_s9  ;;  %p628_p0 = scmp.ne.s32.totalorder (!%p195_p10), %s825_s18, 0 }
  0x1a   : > { %v265_v0 = vld [vmem:[%s1038_s1] sm:$0xf]  ;;  %vm299_vm0 = vcmask 1043456   ;;  %s238_s10 = scalar_select %p237_p12, %s829_s19, 1  ;;  %vm286_vm1 = vcmask 64512   ;;  %vm340_vm2 = vcmask 519168  }
  0x1b   : > { %v301_v1 = vsel %vm299_vm0, %v265_v0, 0  ;;  %s1054_s8 = smov (!%p239_p13, %s600_s8), 31  ;;  %vm349_vm3 = vcmask 523264   ;;  %v843_v30 = vmov 1.0  }
  0x1c   : > { %636 = vmatpush.bf16.msra.mxu3 %v301_v1  ;;  %635 = vmatpush.bf16.msra.mxu1 %v301_v1  ;;  %s601_s11 = sshll.u32 %s238_s10, 5 }
  0x1d   : > { %310 = vmatpush.bf16.msra.mxu0 %v301_v1  ;;  %s242_s12 = sadd.s32 %s601_s11, %s1054_s8  ;;  %s964_s8 = scalar_lea.vmem [#allocation4], %s945_s9 }
  0x1e   : > { %s602_s13 = sshll.u32 %s242_s12, 2 }
  0x1f   : > { %s244_s24 = scalar_lea.vmem %s1039_s0, %s602_s13  ;;  %s254_s6 = scalar_lea.vmem %s1031_s2, %s602_s13 }
  0x20   : > { %v633_v2 = vld [vmem:[%s244_s24 + $0x10] sm:$0xff]  ;;  %v632_v3 = vld [vmem:[%s244_s24 + $0x8] sm:$0xff]  ;;  %v631_v4 = vld [vmem:[%s244_s24] sm:$0xff] }
  0x21   : > { %624 = vmatmul.msk.bf16.vlgmr.msra.gmra.mxu3 %vm286_vm1, %v633_v2  ;;  %623 = vmatmul.msk.bf16.vlgmr.msra.gmra.mxu1 %vm286_vm1, %v632_v3  ;;  %v634_v5 = vld [vmem:[%s244_s24 + $0x18] sm:$0xff] }
  0x22   : > { %622 = vmatmul.msk.bf16.vlgmr.msra.gmra.mxu0 %vm286_vm1, %v631_v4 }
  0x31   : > { %625 = vmatmul.msk.bf16.gmra.mxu3 %vm286_vm1, %v634_v5 }
  0x9e   : > { %v317_v6 = vpop.f32.mrf.mxu1 }
  0x9f   : > { %v334_v7 = vpack.c.bf16 %v317_v6, %v317_v6  ;;  %v312_v8 = vpop.f32.mrf.mxu0  ;;  %v375_v27 = vmul.f32 %v317_v6, %v317_v6 }
  0xa0   : > { %v332_v9 = vpack.c.bf16 %v312_v8, %v312_v8  ;;  %v373_v29 = vmul.f32 %v312_v8, %v312_v8 }
  0xa1   : > { %343 = vst.msk [vmem:[%s254_s6 + $0x8] sm:$0xf] %vm340_vm2, %v334_v7 }
  0xa2   : > { %341 = vst.msk [vmem:[%s254_s6] sm:$0xf] %vm340_vm2, %v332_v9 }
  0xa4   : > { %v322_v10 = vpop.f32.mrf.mxu3 }
  0xa5   : > { %v336_v11 = vpack.c.bf16 %v322_v10, %v322_v10  ;;  %v377_v25 = vmul.f32 %v322_v10, %v322_v10 }
  0xa6   : > { %v319_v12 = vpop.f32.mrf.mxu1 }
  0xa7   : > { %345 = vst.msk [vmem:[%s254_s6 + $0x10] sm:$0xf] %vm340_vm2, %v336_v11  ;;  %v335_v13 = vpack.c.bf16 %v319_v12, %v319_v12  ;;  %v314_v14 = vpop.f32.mrf.mxu0  ;;  %v376_v26 = vmul.f32 %v319_v12, %v319_v12 }
  0xa8   : > { %v333_v15 = vpack.c.bf16 %v314_v14, %v314_v14  ;;  %v374_v28 = vmul.f32 %v314_v14, %v314_v14 }
  0xa9   : > { %344 = vst.msk [vmem:[%s254_s6 + $0xc] sm:$0xf] %vm340_vm2, %v335_v13 }
  0xaa   : > { %342 = vst.msk [vmem:[%s254_s6 + $0x4] sm:$0xf] %vm340_vm2, %v333_v15 }
  0xac   : > { %v324_v16 = vpop.f32.mrf.mxu3 }
  0xad   : > { %v337_v17 = vpack.c.bf16 %v324_v16, %v324_v16  ;;  %v378_v24 = vmul.f32 %v324_v16, %v324_v16 }
  0xaf   : > { %346 = vst.msk [vmem:[%s254_s6 + $0x14] sm:$0xf] %vm340_vm2, %v337_v17 }
  0xb4   : > { %v327_v18 = vpop.f32.mrf.mxu3 }
  0xb5   : > { %v338_v19 = vpack.c.bf16 %v327_v18, %v327_v18  ;;  %v379_v23 = vmul.f32 %v327_v18, %v327_v18 }
  0xb7   : > { %347 = vst.msk [vmem:[%s254_s6 + $0x18] sm:$0xf] %vm340_vm2, %v338_v19 }
  0xbc   : > { %v329_v20 = vpop.f32.mrf.mxu3 }
  0xbd   : > { %v339_v21 = vpack.c.bf16 %v329_v20, %v329_v20  ;;  %361 = vmatpush.msrb.mxu1 %v329_v20  ;;  %v380_v22 = vmul.f32 %v329_v20, %v329_v20 }
  0xbf   : > { %348 = vst.msk [vmem:[%s254_s6 + $0x1c] sm:$0xf] %vm340_vm2, %v339_v21  ;;  %362 = vmatpush.msrb.mxu1 %v327_v18  ;;  %389 = vmatpush.msra.mxu2 %v380_v22 }
  0xc1   : > { %363 = vmatpush.msrb.mxu1 %v324_v16  ;;  %390 = vmatpush.msra.mxu2 %v379_v23 }
  0xc3   : > { %364 = vmatpush.msrb.mxu1 %v322_v10  ;;  %391 = vmatpush.msra.mxu2 %v378_v24 }
  0xc5   : > { %365 = vmatpush.msrb.mxu1 %v319_v12  ;;  %392 = vmatpush.msra.mxu2 %v377_v25 }
  0xc7   : > { %366 = vmatpush.msrb.mxu1 %v317_v6  ;;  %393 = vmatpush.msra.mxu2 %v376_v26 }
  0xc9   : > { %367 = vmatpush.msrb.mxu1 %v314_v14  ;;  %394 = vmatpush.msra.mxu2 %v375_v27 }
  0xcb   : > { %368 = vmatpush.msrb.mxu1 %v312_v8  ;;  %395 = vmatpush.msra.mxu2 %v374_v28 }
  0xcc   : > { %626 = vmatmul.msk.f32.vlgmr.msrb.gmra.mxu1 %vm349_vm3, %v843_v30 }
  0xcd   : > { %396 = vmatpush.msra.mxu2 %v373_v29 }
  0xce   : > { %627 = vmatmul.msk.f32.vlgmr.msra.gmra.mxu2 %vm349_vm3, %v843_v30 }
 0x149   : > { %v370_v31 = vpop.f32.mrf.mxu1 }
 0x14d   : > { %404 = sbr.rel (%p628_p0) target bundleno = 341 (0x155), region = 32 }
 0x151   : > { %v398_v32 = vpop.f32.mrf.mxu2 }
 0x152   : > { %vm405_vm4 = vcmask 516096   ;;  %v844_v33 = vmov 0.0  }
 0x153   : > { %406 = vst.msk [vmem:[%s229_s7] sm:$0x1] %vm405_vm4, %v844_v33 }
 0x154   : > { %407 = vst.msk [vmem:[%s964_s8] sm:$0x1] %vm405_vm4, %v844_v33 }
 0x155 PF: > { %vm410_vm5 = vcmask 516096   ;;  %s441_s18 = scalar_lea.hbm %s1032_s3, %s829_s19  ;;  %s443_s12 = sshll.u32 %s229_s7, 4  ;;  %s444_s12 = int_to_ptr.vmem [resolvable:$true] %s443_s12 }
 0x156   : > { %s445_s13 = sshll.u32 %s441_s18, 4  ;;  %s454_s24 = scalar_lea.hbm %s1033_s4, %s829_s19  ;;  %s446_s13 = int_to_ptr.hbm [resolvable:$true] %s445_s13 }
 0x157   : > { %s425_s29 = scalar_lea.sflag [#allocation3], %s945_s9  ;;  %s729_s30 = sshra.s32 %s446_s13, 4  ;;  %s730_s30 = int_to_ptr.hbm [resolvable:$true] %s729_s30 }
 0x158   : > { %s731_s6 = scalar_lea.hbm %s730_s30, 1  ;;  %s735_s18 = scalar_lea.hbm %s1032_s3, 2 }
 0x159   : > { %p732_p1 = scmp.ne.s32.totalorder %s730_s30, %s731_s6  ;;  %p736_p5 = scmp.lt.s32.totalorder %s730_s30, %s1032_s3 }
 0x15a   : > { %v408_v34 = vld [vmem:[%s229_s7] sm:$0x1]  ;;  %p737_p6 = scmp.lt.s32.totalorder %s735_s18, %s731_s6 }
 0x15b   : > { %v412_v35 = vld [vmem:[%s964_s8] sm:$0x1]  ;;  %v409_v36 = vadd.f32 %v408_v34, %v370_v31  ;;  %p733_p2 = pnand %p732_p1, %p919_p3 }
 0x15c   : > { %v413_v37 = vadd.f32 %v412_v35, %v398_v32  ;;  %p738_p7 = por %p737_p6, %p736_p5 }
 0x15d   : > { %411 = vst.msk [vmem:[%s229_s7] sm:$0x1] %vm410_vm5, %v409_v36  ;;  %p734_p4 = pneg %p733_p2 }
 0x15e   : > { %414 = vst.msk [vmem:[%s964_s8] sm:$0x1] %vm410_vm5, %v413_v37 }
 0x15f   : > { %p739_p8 = pnand %p738_p7, %p734_p4 }
 0x161   : > { %742 = shalt.err (!%p739_p8)
}
 0x162   : > { %637 = dma.vmem_to_hbm [thread:$0]  (%p919_p3), %s444_s12, 16, %s446_s13, %s425_s29  }
 0x163   : > { %s456_s19 = sshll.u32 %s964_s8, 4  ;;  %s458_s7 = sshll.u32 %s454_s24, 4  ;;  %s457_s19 = int_to_ptr.vmem [resolvable:$true] %s456_s19  ;;  %s459_s7 = int_to_ptr.hbm [resolvable:$true] %s458_s7 }
 0x164   : > { %s429_s14 = scalar_lea.sflag [#allocation5], %s945_s9  ;;  %s757_s23 = sshra.s32 %s459_s7, 4  ;;  %s758_s23 = int_to_ptr.hbm [resolvable:$true] %s757_s23 }
 0x165   : > { %s759_s10 = scalar_lea.hbm %s758_s23, 1  ;;  %s763_s30 = scalar_lea.hbm %s1033_s4, 2 }
 0x166   : > { %p760_p10 = scmp.ne.s32.totalorder %s758_s23, %s759_s10  ;;  %p764_p13 = scmp.lt.s32.totalorder %s758_s23, %s1033_s4 }
 0x167   : > { %p765_p0 = scmp.lt.s32.totalorder %s763_s30, %s759_s10 }
 0x168   : > { %p761_p11 = pnand %p760_p10, %p919_p3 }
 0x169   : > { %p766_p1 = por %p765_p0, %p764_p13 }
 0x16a   : > { %p762_p12 = pneg %p761_p11 }
 0x16c   : > { %p767_p2 = pnand %p766_p1, %p762_p12 }
 0x16e   : > { %770 = shalt.err (!%p767_p2)
}
 0x16f   : > { %638 = dma.vmem_to_hbm [thread:$0]  (%p919_p3), %s457_s19, 16, %s459_s7, %s429_s14  }
 0x170 PF: > { %p648_p4 = scmp.ge.s32.totalorder %s841_s22, 2  ;;  %s482_s9 = sand.u32 1, %s813_s15  }
 0x171   : > { %s483_s8 = scalar_lea.sflag [#allocation3], %s482_s9 }
 0x172   : > { %p642_p5 = pnand %p648_p4, %p929_p9 }
 0x174   : > { %p643_p6 = pneg %p642_p5 }
 0x176   : > { %804 = dma.done.wait (%p643_p6), %s483_s8, 16  }
 0x177   : > { %806 = vsyncadd (%p643_p6), %s483_s8, 4294967280  ;;  %s492_s12 = scalar_lea.sflag [#allocation5], %s482_s9 }
 0x178   : > { %808 = dma.done.wait (%p643_p6), %s492_s12, 16  }
 0x179   : > { %810 = vsyncadd (%p643_p6), %s492_s12, 4294967280  ;;  %s21_s22 = sadd.s32 1, %s841_s22   ;;  %s1040_s15 = smov %s817_s16 }
 0x17a   : > { %p18_p7 = scmp.ge.s32.totalorder %s21_s22, 10   ;;  %s1041_s16 = smov %s821_s17 }
 0x17b   : > { %s1042_s17 = smov %s937_s5  ;;  %s1043_s18 = smov %s833_s20 }
 0x17c   : > { %s1044_s19 = smov %s837_s21  ;;  %s1045_s20 = smov %s1048_s25 }
 0x17d   : > { %s1046_s21 = smov %s1052_s26  ;;  %20 = sbr.rel (!%p18_p7) target bundleno = 10 (0xa), region = 96 }
 0x182   :  { %497 = vsyncpa [#allocation3], 1 }
 0x183   :  { %499 = vsyncpa [#allocation3 + $0x1], 1 }
 0x184   :  { %500 = vsyncpa [#allocation5], 1 }
 0x185   :  { %502 = vsyncpa [#allocation5 + $0x1], 1 }

</bundles_post_ra>
